<compile_context>
chip_gen: v7x
topology: tpu7x:2x2x1
jax: 0.10.0
libtpu: 0.0.40
codegen_flags: <defaults>
</compile_context>

<pallas_src>
import jax
import jax.numpy as jnp
from jax import lax
from jax.experimental import pallas as pl
from jax.experimental.pallas import tpu as pltpu

LANE = 128   # lane width of the output slab / padded last-layer head
R_B1 = 8     # row offset of b1 inside a packed layer block
R_W2 = 16    # row offset of the transposed head inside a packed layer block


def _hw(l, num_layers, in_features):
    # Intermediate layers keep the narrow (F-wide) head; the LAST layer's head
    # is zero-padded to LANE so z leaves the loop already lane-dense.
    return LANE if l == num_layers - 1 else in_features


def _layer_rows(hw):
    used = R_W2 + 2 * hw + 2          # W1 block, b1 block, W2^T rows, 2 bias rows
    return ((used + 7) // 8) * 8      # keep every layer block sublane-aligned


def _layer_bases(num_layers, in_features):
    bases, off = [], 0
    for l in range(num_layers):
        bases.append(off)
        off += _layer_rows(_hw(l, num_layers, in_features))
    return bases, off


def pack_maf_params(w1, b1, w2, b2):
    """Pack stacked MAF parameters into ONE lane-dense (rows, H) f32 slab.

    w1: (L, F, H), b1: (L, H), w2: (L, H, 2F), b2: (L, 2F).
    Done once at parameter-init time, not per forward call.
    """
    L, F, H = w1.shape
    assert F <= 8 and F + 1 <= LANE and H >= LANE
    assert w2.shape == (L, H, 2 * F) and b2.shape == (L, 2 * F) and b1.shape == (L, H)
    blocks = []
    for l in range(L):
        hw = _hw(l, L, F)
        blk = jnp.zeros((_layer_rows(hw), H), jnp.float32)
        blk = blk.at[0:F, :].set(w1[l])                                   # W1 (F, H)
        blk = blk.at[R_B1, :].set(b1[l])                                  # b1 (H,)
        blk = blk.at[R_W2:R_W2 + F, :].set(w2[l, :, :F].T)                # mean head^T
        blk = blk.at[R_W2 + hw:R_W2 + hw + F, :].set(w2[l, :, F:].T)      # logvar head^T
        blk = blk.at[R_W2 + 2 * hw, 0:F].set(b2[l, 0:F])                  # b2 (mean)
        blk = blk.at[R_W2 + 2 * hw + 1, 0:F].set(b2[l, F:])               # b2 (logvar)
        blocks.append(blk)
    return jnp.concatenate(blocks, axis=0)


def maf_forward(x, eps, params):
    """x: (B, F) f32; eps: (L, B, F) f32 (one N(0,1) draw per layer);
    params: output of pack_maf_params.  Returns (z (B, F), log_det_jacobian (B,))."""
    B, F = x.shape
    L = eps.shape[0]
    bases, total_rows = _layer_bases(L, F)
    assert params.shape[0] == total_rows
    assert B % 8 == 0   # full f32 sublane tiles -> unmasked full-width stores

    # Per-call data slab: x and eps zero-padded to LANE lanes -> a single DMA.
    xe = jnp.zeros((L + 1, B, LANE), jnp.float32)
    xe = xe.at[0, :, :F].set(x)
    xe = xe.at[1:, :, :F].set(eps)
    xe = xe.reshape((L + 1) * B, LANE)

    def kernel(xe_ref, p_ref, out_ref):
        xl = xe_ref[0:B, 0:F]                                    # (B, F)
        ldj = jnp.zeros((B, 1), jnp.float32)
        for l in range(L):                                       # statically unrolled
            base = bases[l]
            hw = _hw(l, L, F)
            w1 = p_ref[base:base + F, :]                         # (F, H) lane-dense
            b1 = p_ref[base + R_B1:base + R_B1 + 1, :]           # (1, H)
            w2t = p_ref[base + R_W2:base + R_W2 + 2 * hw, :]     # (2*hw, H) lane-dense
            b2m = p_ref[base + R_W2 + 2 * hw:base + R_W2 + 2 * hw + 1, 0:hw]
            b2v = p_ref[base + R_W2 + 2 * hw + 1:base + R_W2 + 2 * hw + 2, 0:hw]
            eps_l = xe_ref[(l + 1) * B:(l + 2) * B, 0:hw]        # (B, hw)

            # Hidden layer (MXU, f32 accumulate) + ReLU.
            h = jnp.dot(xl, w1, preferred_element_type=jnp.float32) + b1
            h = jnp.maximum(h, 0.0)                              # (B, H)

            # Single merged head matmul, contracting over H against W2^T:
            #   head = h @ W2[l]   (== h · w2t^T), shape (B, 2*hw).
            head = jnp.einsum('bh,ch->bc', h, w2t,
                              preferred_element_type=jnp.float32)
            mean = head[:, 0:hw] + b2m
            log_var = head[:, hw:2 * hw] + b2v                   # padded lanes are exactly 0
            z = mean + jnp.exp(0.5 * log_var) * eps_l
            ldj = ldj + (-0.5) * jnp.sum(log_var, axis=1, keepdims=True)
            xl = z

        # After the (padded) last layer xl is (B, LANE) with exact zeros in
        # lanes >= F; drop the log-det-Jacobian into lane F and store once.
        lane = lax.broadcasted_iota(jnp.int32, (B, LANE), 1)
        out_ref[...] = jnp.where(lane == F, jnp.broadcast_to(ldj, (B, LANE)), xl)

    out = pl.pallas_call(
        kernel,
        out_shape=jax.ShapeDtypeStruct((B, LANE), jnp.float32),
        in_specs=[pl.BlockSpec(memory_space=pltpu.MemorySpace.VMEM),
                  pl.BlockSpec(memory_space=pltpu.MemorySpace.VMEM)],
        out_specs=pl.BlockSpec(memory_space=pltpu.MemorySpace.VMEM),
        # No grid: single invocation, everything resident in VMEM (< 1 MiB).
    )(xe, params)

    return out[:, :F], out[:, F]


def maf_reference(x, w1, b1, w2, b2, eps):
    """Plain-JAX reference of the PyTorch forward, using the same eps draws."""
    L, F = w1.shape[0], x.shape[1]
    ldj = jnp.zeros((x.shape[0],), jnp.float32)
    for l in range(L):
        h = jnp.maximum(x @ w1[l] + b1[l], 0.0)
        out = h @ w2[l] + b2[l]
        mean, log_var = out[:, :F], out[:, F:]
        z = mean + jnp.exp(0.5 * log_var) * eps[l]
        ldj = ldj + (-0.5) * jnp.sum(log_var, axis=1)
        x = z
    return z, ldj


if __name__ == "__main__":
    key = jax.random.PRNGKey(0)
    B, F, H, L = 8, 4, 128, 4   # batch, in_features (iris=4), hidden, num_layers

    k_x, k_w1, k_b1, k_w2, k_b2, k_eps = jax.random.split(key, 6)

    x = jax.random.normal(k_x, (B, F), jnp.float32)

    # Deterministic PyTorch-Linear-style init: U(-1/sqrt(fan_in), 1/sqrt(fan_in)).
    lim1 = 1.0 / jnp.sqrt(F)
    lim2 = 1.0 / jnp.sqrt(H)
    w1 = jax.random.uniform(k_w1, (L, F, H), jnp.float32, -lim1, lim1)
    b1 = jax.random.uniform(k_b1, (L, H), jnp.float32, -lim1, lim1)
    w2 = jax.random.uniform(k_w2, (L, H, 2 * F), jnp.float32, -lim2, lim2)
    b2 = jax.random.uniform(k_b2, (L, 2 * F), jnp.float32, -lim2, lim2)

    # Deterministic stand-in for torch.randn_like, one draw per layer.
    # TODO(synk): could be generated in-kernel with pltpu.prng_seed/prng_random_bits,
    # at the cost of bit-matching the jax.random reference.
    eps = jax.random.normal(k_eps, (L, B, F), jnp.float32)

    params = pack_maf_params(w1, b1, w2, b2)   # one-time, init-style packing

    z, ldj = maf_forward(x, eps, params)
    jax.block_until_ready((z, ldj))

    z_ref, ldj_ref = maf_reference(x, w1, b1, w2, b2, eps)
    assert z.shape == (B, F) and ldj.shape == (B,)
    assert jnp.allclose(z, z_ref, atol=1e-5, rtol=1e-5)
    assert jnp.allclose(ldj, ldj_ref, atol=1e-5, rtol=1e-5)

    print("KERNEL_OK")
</pallas_src>

<mosaic_0001>
module attributes {stable_mosaic.version = 11 : i64} {
  func.func @kernel(%arg0: memref<40x128xf32, #tpu.memory_space<vmem>>, %arg1: memref<376x128xf32, #tpu.memory_space<vmem>>, %arg2: memref<8x128xf32, #tpu.memory_space<vmem>>) attributes {dimension_semantics = [], scalar_prefetch = 0 : i64, scratch_operands = 0 : i64, tpu.core_type = #tpu.core_type<tc>} {
    %c0 = arith.constant 0 : index
    %c0_0 = arith.constant 0 : index
    %0 = vector.load %arg0[%c0, %c0_0] : memref<40x128xf32, #tpu.memory_space<vmem>>, vector<8x4xf32>
    %cst = arith.constant 0.000000e+00 : f32
    %1 = vector.broadcast %cst : f32 to vector<8x1xf32>
    %c0_1 = arith.constant 0 : index
    %c0_2 = arith.constant 0 : index
    %2 = vector.load %arg1[%c0_1, %c0_2] : memref<376x128xf32, #tpu.memory_space<vmem>>, vector<4x128xf32>
    %c8 = arith.constant 8 : index
    %c0_3 = arith.constant 0 : index
    %3 = vector.load %arg1[%c8, %c0_3] : memref<376x128xf32, #tpu.memory_space<vmem>>, vector<1x128xf32>
    %c16 = arith.constant 16 : index
    %c0_4 = arith.constant 0 : index
    %4 = vector.load %arg1[%c16, %c0_4] : memref<376x128xf32, #tpu.memory_space<vmem>>, vector<8x128xf32>
    %c24 = arith.constant 24 : index
    %c0_5 = arith.constant 0 : index
    %5 = vector.load %arg1[%c24, %c0_5] : memref<376x128xf32, #tpu.memory_space<vmem>>, vector<1x4xf32>
    %c25 = arith.constant 25 : index
    %c0_6 = arith.constant 0 : index
    %6 = vector.load %arg1[%c25, %c0_6] : memref<376x128xf32, #tpu.memory_space<vmem>>, vector<1x4xf32>
    %c8_7 = arith.constant 8 : index
    %c0_8 = arith.constant 0 : index
    %7 = vector.load %arg0[%c8_7, %c0_8] : memref<40x128xf32, #tpu.memory_space<vmem>>, vector<8x4xf32>
    %cst_9 = arith.constant dense<0.000000e+00> : vector<8x128xf32>
    %8 = tpu.matmul %0, %2, %cst_9 {dimension_numbers = #tpu.dot_dimension_numbers<[1], [0], [0], [1], [0, 0, 1, 1], [], []>} : vector<8x4xf32>, vector<4x128xf32>, vector<8x128xf32> -> vector<8x128xf32>
    %9 = vector.broadcast %3 : vector<1x128xf32> to vector<8x128xf32>
    %10 = arith.addf %8, %9 : vector<8x128xf32>
    %cst_10 = arith.constant 0.000000e+00 : f32
    %11 = vector.broadcast %cst_10 : f32 to vector<8x128xf32>
    %12 = arith.maximumf %10, %11 : vector<8x128xf32>
    "tpu.trace_start"() <{level = 10 : i32, message = "bh,ch->bc"}> : () -> ()
    %cst_11 = arith.constant dense<0.000000e+00> : vector<8x8xf32>
    %13 = tpu.matmul %12, %4, %cst_11 {dimension_numbers = #tpu.dot_dimension_numbers<[1], [1], [0], [0], [0, 0, 1, 0], [], []>} : vector<8x128xf32>, vector<8x128xf32>, vector<8x8xf32> -> vector<8x8xf32>
    "tpu.trace_stop"() : () -> ()
    %14 = vector.extract_strided_slice %13 {offsets = [0, 0], sizes = [8, 4], strides = [1, 1]} : vector<8x8xf32> to vector<8x4xf32>
    %15 = vector.broadcast %5 : vector<1x4xf32> to vector<8x4xf32>
    %16 = arith.addf %14, %15 : vector<8x4xf32>
    %17 = vector.extract_strided_slice %13 {offsets = [0, 4], sizes = [8, 4], strides = [1, 1]} : vector<8x8xf32> to vector<8x4xf32>
    %18 = vector.broadcast %6 : vector<1x4xf32> to vector<8x4xf32>
    %19 = arith.addf %17, %18 : vector<8x4xf32>
    %cst_12 = arith.constant 5.000000e-01 : f32
    %20 = vector.broadcast %cst_12 : f32 to vector<8x4xf32>
    %21 = arith.mulf %20, %19 : vector<8x4xf32>
    %22 = math.exp %21 : vector<8x4xf32>
    %23 = arith.mulf %22, %7 : vector<8x4xf32>
    %24 = arith.addf %16, %23 : vector<8x4xf32>
    %cst_13 = arith.constant dense<0.000000e+00> : vector<8xf32>
    %25 = vector.multi_reduction <add>, %19, %cst_13 [1] : vector<8x4xf32> to vector<8xf32>
    %26 = vector.shape_cast %25 : vector<8xf32> to vector<8x1xf32>
    %cst_14 = arith.constant -5.000000e-01 : f32
    %27 = vector.broadcast %cst_14 : f32 to vector<8x1xf32>
    %28 = arith.mulf %27, %26 : vector<8x1xf32>
    %29 = arith.addf %1, %28 : vector<8x1xf32>
    %c32 = arith.constant 32 : index
    %c0_15 = arith.constant 0 : index
    %30 = vector.load %arg1[%c32, %c0_15] : memref<376x128xf32, #tpu.memory_space<vmem>>, vector<4x128xf32>
    %c40 = arith.constant 40 : index
    %c0_16 = arith.constant 0 : index
    %31 = vector.load %arg1[%c40, %c0_16] : memref<376x128xf32, #tpu.memory_space<vmem>>, vector<1x128xf32>
    %c48 = arith.constant 48 : index
    %c0_17 = arith.constant 0 : index
    %32 = vector.load %arg1[%c48, %c0_17] : memref<376x128xf32, #tpu.memory_space<vmem>>, vector<8x128xf32>
    %c56 = arith.constant 56 : index
    %c0_18 = arith.constant 0 : index
    %33 = vector.load %arg1[%c56, %c0_18] : memref<376x128xf32, #tpu.memory_space<vmem>>, vector<1x4xf32>
    %c57 = arith.constant 57 : index
    %c0_19 = arith.constant 0 : index
    %34 = vector.load %arg1[%c57, %c0_19] : memref<376x128xf32, #tpu.memory_space<vmem>>, vector<1x4xf32>
    %c16_20 = arith.constant 16 : index
    %c0_21 = arith.constant 0 : index
    %35 = vector.load %arg0[%c16_20, %c0_21] : memref<40x128xf32, #tpu.memory_space<vmem>>, vector<8x4xf32>
    %cst_22 = arith.constant dense<0.000000e+00> : vector<8x128xf32>
    %36 = tpu.matmul %24, %30, %cst_22 {dimension_numbers = #tpu.dot_dimension_numbers<[1], [0], [0], [1], [0, 0, 1, 1], [], []>} : vector<8x4xf32>, vector<4x128xf32>, vector<8x128xf32> -> vector<8x128xf32>
    %37 = vector.broadcast %31 : vector<1x128xf32> to vector<8x128xf32>
    %38 = arith.addf %36, %37 : vector<8x128xf32>
    %cst_23 = arith.constant 0.000000e+00 : f32
    %39 = vector.broadcast %cst_23 : f32 to vector<8x128xf32>
    %40 = arith.maximumf %38, %39 : vector<8x128xf32>
    "tpu.trace_start"() <{level = 10 : i32, message = "bh,ch->bc"}> : () -> ()
    %cst_24 = arith.constant dense<0.000000e+00> : vector<8x8xf32>
    %41 = tpu.matmul %40, %32, %cst_24 {dimension_numbers = #tpu.dot_dimension_numbers<[1], [1], [0], [0], [0, 0, 1, 0], [], []>} : vector<8x128xf32>, vector<8x128xf32>, vector<8x8xf32> -> vector<8x8xf32>
    "tpu.trace_stop"() : () -> ()
    %42 = vector.extract_strided_slice %41 {offsets = [0, 0], sizes = [8, 4], strides = [1, 1]} : vector<8x8xf32> to vector<8x4xf32>
    %43 = vector.broadcast %33 : vector<1x4xf32> to vector<8x4xf32>
    %44 = arith.addf %42, %43 : vector<8x4xf32>
    %45 = vector.extract_strided_slice %41 {offsets = [0, 4], sizes = [8, 4], strides = [1, 1]} : vector<8x8xf32> to vector<8x4xf32>
    %46 = vector.broadcast %34 : vector<1x4xf32> to vector<8x4xf32>
    %47 = arith.addf %45, %46 : vector<8x4xf32>
    %cst_25 = arith.constant 5.000000e-01 : f32
    %48 = vector.broadcast %cst_25 : f32 to vector<8x4xf32>
    %49 = arith.mulf %48, %47 : vector<8x4xf32>
    %50 = math.exp %49 : vector<8x4xf32>
    %51 = arith.mulf %50, %35 : vector<8x4xf32>
    %52 = arith.addf %44, %51 : vector<8x4xf32>
    %cst_26 = arith.constant dense<0.000000e+00> : vector<8xf32>
    %53 = vector.multi_reduction <add>, %47, %cst_26 [1] : vector<8x4xf32> to vector<8xf32>
    %54 = vector.shape_cast %53 : vector<8xf32> to vector<8x1xf32>
    %cst_27 = arith.constant -5.000000e-01 : f32
    %55 = vector.broadcast %cst_27 : f32 to vector<8x1xf32>
    %56 = arith.mulf %55, %54 : vector<8x1xf32>
    %57 = arith.addf %29, %56 : vector<8x1xf32>
    %c64 = arith.constant 64 : index
    %c0_28 = arith.constant 0 : index
    %58 = vector.load %arg1[%c64, %c0_28] : memref<376x128xf32, #tpu.memory_space<vmem>>, vector<4x128xf32>
    %c72 = arith.constant 72 : index
    %c0_29 = arith.constant 0 : index
    %59 = vector.load %arg1[%c72, %c0_29] : memref<376x128xf32, #tpu.memory_space<vmem>>, vector<1x128xf32>
    %c80 = arith.constant 80 : index
    %c0_30 = arith.constant 0 : index
    %60 = vector.load %arg1[%c80, %c0_30] : memref<376x128xf32, #tpu.memory_space<vmem>>, vector<8x128xf32>
    %c88 = arith.constant 88 : index
    %c0_31 = arith.constant 0 : index
    %61 = vector.load %arg1[%c88, %c0_31] : memref<376x128xf32, #tpu.memory_space<vmem>>, vector<1x4xf32>
    %c89 = arith.constant 89 : index
    %c0_32 = arith.constant 0 : index
    %62 = vector.load %arg1[%c89, %c0_32] : memref<376x128xf32, #tpu.memory_space<vmem>>, vector<1x4xf32>
    %c24_33 = arith.constant 24 : index
    %c0_34 = arith.constant 0 : index
    %63 = vector.load %arg0[%c24_33, %c0_34] : memref<40x128xf32, #tpu.memory_space<vmem>>, vector<8x4xf32>
    %cst_35 = arith.constant dense<0.000000e+00> : vector<8x128xf32>
    %64 = tpu.matmul %52, %58, %cst_35 {dimension_numbers = #tpu.dot_dimension_numbers<[1], [0], [0], [1], [0, 0, 1, 1], [], []>} : vector<8x4xf32>, vector<4x128xf32>, vector<8x128xf32> -> vector<8x128xf32>
    %65 = vector.broadcast %59 : vector<1x128xf32> to vector<8x128xf32>
    %66 = arith.addf %64, %65 : vector<8x128xf32>
    %cst_36 = arith.constant 0.000000e+00 : f32
    %67 = vector.broadcast %cst_36 : f32 to vector<8x128xf32>
    %68 = arith.maximumf %66, %67 : vector<8x128xf32>
    "tpu.trace_start"() <{level = 10 : i32, message = "bh,ch->bc"}> : () -> ()
    %cst_37 = arith.constant dense<0.000000e+00> : vector<8x8xf32>
    %69 = tpu.matmul %68, %60, %cst_37 {dimension_numbers = #tpu.dot_dimension_numbers<[1], [1], [0], [0], [0, 0, 1, 0], [], []>} : vector<8x128xf32>, vector<8x128xf32>, vector<8x8xf32> -> vector<8x8xf32>
    "tpu.trace_stop"() : () -> ()
    %70 = vector.extract_strided_slice %69 {offsets = [0, 0], sizes = [8, 4], strides = [1, 1]} : vector<8x8xf32> to vector<8x4xf32>
    %71 = vector.broadcast %61 : vector<1x4xf32> to vector<8x4xf32>
    %72 = arith.addf %70, %71 : vector<8x4xf32>
    %73 = vector.extract_strided_slice %69 {offsets = [0, 4], sizes = [8, 4], strides = [1, 1]} : vector<8x8xf32> to vector<8x4xf32>
    %74 = vector.broadcast %62 : vector<1x4xf32> to vector<8x4xf32>
    %75 = arith.addf %73, %74 : vector<8x4xf32>
    %cst_38 = arith.constant 5.000000e-01 : f32
    %76 = vector.broadcast %cst_38 : f32 to vector<8x4xf32>
    %77 = arith.mulf %76, %75 : vector<8x4xf32>
    %78 = math.exp %77 : vector<8x4xf32>
    %79 = arith.mulf %78, %63 : vector<8x4xf32>
    %80 = arith.addf %72, %79 : vector<8x4xf32>
    %cst_39 = arith.constant dense<0.000000e+00> : vector<8xf32>
    %81 = vector.multi_reduction <add>, %75, %cst_39 [1] : vector<8x4xf32> to vector<8xf32>
    %82 = vector.shape_cast %81 : vector<8xf32> to vector<8x1xf32>
    %cst_40 = arith.constant -5.000000e-01 : f32
    %83 = vector.broadcast %cst_40 : f32 to vector<8x1xf32>
    %84 = arith.mulf %83, %82 : vector<8x1xf32>
    %85 = arith.addf %57, %84 : vector<8x1xf32>
    %c96 = arith.constant 96 : index
    %c0_41 = arith.constant 0 : index
    %86 = vector.load %arg1[%c96, %c0_41] : memref<376x128xf32, #tpu.memory_space<vmem>>, vector<4x128xf32>
    %c104 = arith.constant 104 : index
    %c0_42 = arith.constant 0 : index
    %87 = vector.load %arg1[%c104, %c0_42] : memref<376x128xf32, #tpu.memory_space<vmem>>, vector<1x128xf32>
    %c112 = arith.constant 112 : index
    %c0_43 = arith.constant 0 : index
    %88 = vector.load %arg1[%c112, %c0_43] : memref<376x128xf32, #tpu.memory_space<vmem>>, vector<256x128xf32>
    %c368 = arith.constant 368 : index
    %c0_44 = arith.constant 0 : index
    %89 = vector.load %arg1[%c368, %c0_44] : memref<376x128xf32, #tpu.memory_space<vmem>>, vector<1x128xf32>
    %c369 = arith.constant 369 : index
    %c0_45 = arith.constant 0 : index
    %90 = vector.load %arg1[%c369, %c0_45] : memref<376x128xf32, #tpu.memory_space<vmem>>, vector<1x128xf32>
    %c32_46 = arith.constant 32 : index
    %c0_47 = arith.constant 0 : index
    %91 = vector.load %arg0[%c32_46, %c0_47] : memref<40x128xf32, #tpu.memory_space<vmem>>, vector<8x128xf32>
    %cst_48 = arith.constant dense<0.000000e+00> : vector<8x128xf32>
    %92 = tpu.matmul %80, %86, %cst_48 {dimension_numbers = #tpu.dot_dimension_numbers<[1], [0], [0], [1], [0, 0, 1, 1], [], []>} : vector<8x4xf32>, vector<4x128xf32>, vector<8x128xf32> -> vector<8x128xf32>
    %93 = vector.broadcast %87 : vector<1x128xf32> to vector<8x128xf32>
    %94 = arith.addf %92, %93 : vector<8x128xf32>
    %cst_49 = arith.constant 0.000000e+00 : f32
    %95 = vector.broadcast %cst_49 : f32 to vector<8x128xf32>
    %96 = arith.maximumf %94, %95 : vector<8x128xf32>
    "tpu.trace_start"() <{level = 10 : i32, message = "bh,ch->bc"}> : () -> ()
    %cst_50 = arith.constant dense<0.000000e+00> : vector<8x256xf32>
    %97 = tpu.matmul %96, %88, %cst_50 {dimension_numbers = #tpu.dot_dimension_numbers<[1], [1], [0], [0], [0, 0, 1, 0], [], []>} : vector<8x128xf32>, vector<256x128xf32>, vector<8x256xf32> -> vector<8x256xf32>
    "tpu.trace_stop"() : () -> ()
    %98 = vector.extract_strided_slice %97 {offsets = [0, 0], sizes = [8, 128], strides = [1, 1]} : vector<8x256xf32> to vector<8x128xf32>
    %99 = vector.broadcast %89 : vector<1x128xf32> to vector<8x128xf32>
    %100 = arith.addf %98, %99 : vector<8x128xf32>
    %101 = vector.extract_strided_slice %97 {offsets = [0, 128], sizes = [8, 128], strides = [1, 1]} : vector<8x256xf32> to vector<8x128xf32>
    %102 = vector.broadcast %90 : vector<1x128xf32> to vector<8x128xf32>
    %103 = arith.addf %101, %102 : vector<8x128xf32>
    %cst_51 = arith.constant 5.000000e-01 : f32
    %104 = vector.broadcast %cst_51 : f32 to vector<8x128xf32>
    %105 = arith.mulf %104, %103 : vector<8x128xf32>
    %106 = math.exp %105 : vector<8x128xf32>
    %107 = arith.mulf %106, %91 : vector<8x128xf32>
    %108 = arith.addf %100, %107 : vector<8x128xf32>
    %cst_52 = arith.constant dense<0.000000e+00> : vector<8xf32>
    %109 = vector.multi_reduction <add>, %103, %cst_52 [1] : vector<8x128xf32> to vector<8xf32>
    %110 = vector.shape_cast %109 : vector<8xf32> to vector<8x1xf32>
    %cst_53 = arith.constant -5.000000e-01 : f32
    %111 = vector.broadcast %cst_53 : f32 to vector<8x1xf32>
    %112 = arith.mulf %111, %110 : vector<8x1xf32>
    %113 = arith.addf %85, %112 : vector<8x1xf32>
    %114 = tpu.iota {dimensions = array<i32: 1>} : vector<8x128xi32>
    %c4_i32 = arith.constant 4 : i32
    %115 = vector.broadcast %c4_i32 : i32 to vector<8x128xi32>
    %116 = arith.cmpi eq, %114, %115 : vector<8x128xi32>
    %117 = vector.shape_cast %113 : vector<8x1xf32> to vector<8x1xf32>
    %118 = vector.broadcast %117 : vector<8x1xf32> to vector<8x128xf32>
    %119 = arith.select %116, %118, %108 : vector<8x128xi1>, vector<8x128xf32>
    %c0_54 = arith.constant 0 : index
    %c0_55 = arith.constant 0 : index
    %120 = vector.load %arg2[%c0_54, %c0_55] : memref<8x128xf32, #tpu.memory_space<vmem>>, vector<8x128xf32>
    tpu.vector_store %arg2[%c0_54, %c0_55], %119 {strides = array<i32>} : memref<8x128xf32, #tpu.memory_space<vmem>>, vector<8x128xf32>,
    return
  }
}

</mosaic_0001>

<bundles_post_ra>
// kernel: tpu_custom_call.1
= control target key start
LH: loop header
LB: loop body
LE: loop exit
PB: predicated region body
PF: predicated region fallthrough
CT: control target
= control target key end

     0   :  { %7 = vsyncpa [#allocation3], 0  ;;  %s1179_s0 = inlined_call_operand.hbm [shape: f32[40,128], index: 0, kind: input, shape index: {}]   ;;  %s1180_s1 = inlined_call_operand.hbm [shape: f32[376,128], index: 1, kind: input, shape index: {}]   ;;  %s1181_s2 = inlined_call_operand.hbm [shape: f32[8,128], index: 2, kind: output, shape index: {}]  }
   0x1   :  { %8 = vsyncpa [#allocation6], 0 }
   0x2   :  { %9 = vsyncpa [#allocation4], 0  ;;  %s1075_s9 = smov [#allocation2]   ;;  %s1003_s13 = scalar_lea.hbm %s1179_s0, 640 }
   0x3   :  { %s15_s10 = sshll.u32 %s1075_s9, 4  ;;  %p1004_p0 = scmp.ne.s32.totalorder %s1179_s0, %s1003_s13  ;;  %s16_s10 = int_to_ptr.vmem [resolvable:$true] %s15_s10 }
   0x4   :  { %p1007_p1 = scmp.lt.u32.totalorder %s1003_s13, %s1179_s0 }
   0x6   :  { %p1009_p2 = pnand %p1007_p1, %p1004_p0 }
   0x8   :  { %1012 = shalt.err (!%p1009_p2)
}
   0x9   :  { %s1013_s18 = scalar_lea.vmem %s16_s10, 640  ;;  %p1018_p4 = scmp.lt.s32.totalorder %s16_s10, %s16_s10 }
   0xa   :  { %p1014_p3 = scmp.ne.s32.totalorder %s16_s10, %s1013_s18  ;;  %p1019_p5 = scmp.lt.s32.totalorder %s1013_s18, %s1013_s18 }
   0xc   :  { %p1020_p6 = por %p1019_p5, %p1018_p4 }
   0xe   :  { %p1021_p7 = pnand %p1020_p6, %p1014_p3 }
  0x10   :  { %1024 = shalt.err (!%p1021_p7)
}
  0x11   :  { %s1076_s19 = smov 128   ;;  %s1077_s20 = smov 8  }
  0x12   :  { %21 = dma.hbm_to_vmem [thread:$0]  %s1179_s0, 640, %s16_s10, [#allocation3], %s1076_s19, %s1076_s19, %s1077_s20  }
  0x13   :  { %s1078_s23 = smov [#allocation5]   ;;  %s1025_s27 = scalar_lea.hbm %s1180_s1, 6016 }
  0x14   :  { %s27_s24 = sshll.u32 %s1078_s23, 4  ;;  %p1026_p8 = scmp.ne.s32.totalorder %s1180_s1, %s1025_s27  ;;  %s28_s24 = int_to_ptr.vmem [resolvable:$true] %s27_s24 }
  0x15   :  { %p1029_p9 = scmp.lt.u32.totalorder %s1025_s27, %s1180_s1 }
  0x17   :  { %p1031_p10 = pnand %p1029_p9, %p1026_p8 }
  0x19   :  { %1034 = shalt.err (!%p1031_p10)
}
  0x1a   :  { %s1035_s4 = scalar_lea.vmem %s28_s24, 6016  ;;  %p1040_p12 = scmp.lt.s32.totalorder %s28_s24, %s28_s24 }
  0x1b   :  { %p1036_p11 = scmp.ne.s32.totalorder %s28_s24, %s1035_s4  ;;  %p1041_p13 = scmp.lt.s32.totalorder %s1035_s4, %s1035_s4 }
  0x1d   :  { %p1042_p0 = por %p1041_p13, %p1040_p12 }
  0x1f   :  { %p1043_p1 = pnand %p1042_p0, %p1036_p11 }
  0x21   :  { %1046 = shalt.err (!%p1043_p1)
}
  0x22   :  { %33 = dma.hbm_to_vmem [thread:$0]  %s1180_s1, 6016, %s28_s24, [#allocation6], %s1076_s19, %s1076_s19, %s1077_s20  }
  0x23   :  { %1069 = dma.done.wait [#allocation3], 640  }
  0x24   :  { %1070 = vsyncadd [#allocation3], 4294966656 }
  0x25   :  { %1071 = dma.done.wait [#allocation6], 6016  }
  0x26   :  { %1072 = vsyncadd [#allocation6], 4294961280  ;;  %v1079_v0 = vmov 0.0   ;;  %vm1080_vm0 = vmmov 0   ;;  %vm55_vm1 = vcmask 1043456   ;;  %vm51_vm2 = vcmask 31744  }
  0x27   :  { %919 = vmatprep.subr.mxu0 %v1079_v0  ;;  %921 = vmatprep.mubr.msk.f32.mxu0 %vm1080_vm0, %v1079_v0  ;;  %v41_v1 = vld [vmem:[#allocation5] sm:$0xf]  ;;  %v40_v2 = vld [vmem:[#allocation2] sm:$0xff]  ;;  %v43_v3 = vld [vmem:[#allocation5 + $0x10] sm:$0xff]  ;;  %s1081_s1 = smov 4   ;;  %s1082_s6 = smov 124  }
  0x28   :  { %920 = vmatpush3.msk.msra.mxu0 %vm55_vm1, %v41_v1  ;;  %v855_v4 = vld [vmem:[#allocation5 + $0x19] ss:$0 sm:$0xff]  ;;  %v46_v5 = vld [vmem:[#allocation2 + $0x8] sm:$0xff]  ;;  %v851_v6 = vld [vmem:[#allocation5 + $0x8] ss:$0 sm:$0xff]  ;;  %s1083_s7 = smov [#allocation7]  }
  0x29   :  { %922 = vmatmul.mubr.msk.f32.vlgmr.msra.gmra.mrb[0].mxu0 %vm51_vm2, %v40_v2  ;;  %924 = vmatprep.subr.mxu0 %v1079_v0  ;;  %v236_v11 = vld [vmem:[#allocation5 + $0x20] sm:$0xf]  ;;  %v854_v21 = vld [vmem:[#allocation5 + $0x18] ss:$0 sm:$0xff]  ;;  %v238_v25 = vld [vmem:[#allocation5 + $0x30] sm:$0xff]  ;;  %s841_s8 = sshll.u32 %s1083_s7, 4  ;;  %s842_s8 = int_to_ptr.vmem [resolvable:$true] %s841_s8 }
  0x2a   :  { %926 = vmatprep.mubr.msk.f32.mxu0 %vm1080_vm0, %v1079_v0  ;;  %210 = vrot.lane.b32.xlu0 %v855_v4, %s1081_s1  ;;  %v860_v26 = vld [vmem:[#allocation5 + $0x39] ss:$0 sm:$0xff]  ;;  %v241_v27 = vld [vmem:[#allocation2 + $0x10] sm:$0xff]  ;;  %v429_v33 = vld [vmem:[#allocation5 + $0x40] sm:$0xf]  ;;  %s1047_s9 = scalar_lea.vmem %s842_s8, 128  ;;  %p1052_p3 = scmp.lt.s32.totalorder %s842_s8, %s842_s8 }
  0x2b   :  { %v856_v28 = vld [vmem:[#allocation5 + $0x28] ss:$0 sm:$0xff]  ;;  %v434_v43 = vld [vmem:[#allocation2 + $0x18] sm:$0xff]  ;;  %v859_v44 = vld [vmem:[#allocation5 + $0x38] ss:$0 sm:$0xff]  ;;  %p1048_p2 = scmp.ne.s32.totalorder %s842_s8, %s1047_s9  ;;  %p1053_p4 = scmp.lt.s32.totalorder %s1047_s9, %s1047_s9 }
  0x2c   :  { %v431_v48 = vld [vmem:[#allocation5 + $0x50] sm:$0xff]  ;;  %v865_v49 = vld [vmem:[#allocation5 + $0x59] ss:$0 sm:$0xff]  ;;  %v861_v50 = vld [vmem:[#allocation5 + $0x48] ss:$0 sm:$0xff] }
  0x2d   :  { %v622_v55 = vld [vmem:[#allocation5 + $0x60] sm:$0xf]  ;;  %p1054_p5 = por %p1053_p4, %p1052_p3 }
  0x2e   :  { %218 = vrot.lane.b32.xlu0 %v46_v5, %s1081_s1  ;;  %v864_v5 = vld [vmem:[#allocation5 + $0x58] ss:$0 sm:$0xff] }
  0x2f   :  { %925 = vmatpush3.xpose.msra.mxu0 %v43_v3  ;;  %p1055_p6 = pnand %p1054_p5, %p1048_p2 }
  0x30   :  { %929 = vmatprep.subr.mxu0 %v1079_v0 }
  0x32   :  { %411 = vrot.lane.b32.xlu0 %v241_v27, %s1081_s1  ;;  %v629_v27 = vld [vmem:[#allocation5 + $0x98] sm:$0xff] }
  0x36   :  { %596 = vrot.lane.b32.xlu0 %v865_v49, %s1081_s1 }
  0x9c   :  { %v211_v12 = vpop.permute.xlu0 %210 }
  0xa0   :  { %v219_v18 = vpop.permute.xlu0 %218 }
  0xa4   :  { %v412_v40 = vpop.permute.xlu0 %411 }
  0xa8   :  { %v597_v56 = vpop.permute.xlu0 %596 }
  0xfc   :  { %v125_v7 = vpop.f32.mrb[0].mxu0 }
  0xfd   :  { %v126_v8 = vadd.f32 %v851_v6, %v125_v7  ;;  %v923_v9 = vpop.f32.mrb[1].mxu0 }
  0xff   :  { %v129_v10 = vmax.f32 %v126_v8, 0.0 }
 0x101   :  { %927 = vmatmul.mubr.f32.vlgmr.msra.gmra.mrb[2].mxu0 %v129_v10 }
 0x102   :  { %931 = vmatprep.mubr.msk.f32.mxu0 %vm1080_vm0, %v1079_v0  ;;  %930 = vmatpush3.msk.msra.mxu0 %vm55_vm1, %v236_v11  ;;  %v640_v11 = vld [vmem:[#allocation5 + $0xf0] sm:$0xff] }
 0x103   :  { %934 = vmatprep.subr.mxu0 %v1079_v0 }
 0x1d4   :  { %v196_v13 = vpop.f32.mrb[2].mxu0 }
 0x1d5   :  { %v213_v14 = vadd.f32 %v211_v12, %v196_v13  ;;  %v928_v15 = vpop.f32.mrb[3].mxu0  ;;  %v204_v22 = vadd.f32 %v854_v21, %v196_v13  ;;  %v641_v12 = vld [vmem:[#allocation5 + $0xf8] sm:$0xff]  ;;  %v624_v13 = vld [vmem:[#allocation5 + $0x70] sm:$0xff]  ;;  %v627_v21 = vld [vmem:[#allocation5 + $0x88] sm:$0xff] }
 0x1d6   :  { %v625_v15 = vld [vmem:[#allocation5 + $0x78] sm:$0xff] }
 0x1d7   :  { %v214_v16 = vmul.f32 0.5, %v213_v14 }
 0x1d9   :  { %v215_v17 = vmul.f32 1.442695, %v214_v16  ;;  %v642_v16 = vld [vmem:[#allocation5 + $0x100] sm:$0xff] }
 0x1db   :  { %995 = vpow2.f32 %v215_v17  ;;  %v643_v17 = vld [vmem:[#allocation5 + $0x108] sm:$0xff] }
 0x1e5   :  { %v996_v19 = vpop.eup %995 }
 0x1e6   :  { %v221_v20 = vmul.f32 %v996_v19, %v219_v18  ;;  %v956_v18 = vpack.c.bf16 %v625_v15, %v624_v13  ;;  %v958_v19 = vpack.c.bf16 %v643_v17, %v642_v16  ;;  %v830_v15 = vlaneseq }
 0x1e8   :  { %223 = vrot.lane.b32.xlu1 %v221_v20, %s1082_s6  ;;  %v626_v20 = vld [vmem:[#allocation5 + $0x80] sm:$0xff] }
 0x1ec   :  { %403 = vrot.lane.b32.xlu1 %v860_v26, %s1081_s1  ;;  %v628_v26 = vld [vmem:[#allocation5 + $0x90] sm:$0xff] }
 0x25a   :  { %v224_v23 = vpop.permute.xlu1 %223 }
 0x25b   :  { %v226_v24 = vadd.f32 %v224_v23, %v204_v22  ;;  %v644_v22 = vld [vmem:[#allocation5 + $0x110] sm:$0xff]  ;;  %v645_v23 = vld [vmem:[#allocation5 + $0x118] sm:$0xff] }
 0x25d   :  { %932 = vmatmul.mubr.msk.f32.vlgmr.msra.gmra.mrb[4].mxu0 %vm51_vm2, %v226_v24  ;;  %v960_v24 = vpack.c.bf16 %v627_v21, %v626_v20 }
 0x25e   :  { %936 = vmatprep.mubr.msk.f32.mxu0 %vm1080_vm0, %v1079_v0  ;;  %935 = vmatpush3.xpose.msra.mxu0 %v238_v25  ;;  %v404_v34 = vpop.permute.xlu1 %403  ;;  %v962_v25 = vpack.c.bf16 %v645_v23, %v644_v22 }
 0x25f   :  { %939 = vmatprep.subr.mxu0 %v1079_v0 }
 0x330   :  { %v318_v29 = vpop.f32.mrb[4].mxu0 }
 0x331   :  { %v319_v30 = vadd.f32 %v856_v28, %v318_v29  ;;  %v933_v31 = vpop.f32.mrb[5].mxu0  ;;  %v646_v28 = vld [vmem:[#allocation5 + $0x120] sm:$0xff]  ;;  %v647_v29 = vld [vmem:[#allocation5 + $0x128] sm:$0xff] }
 0x332   :  { %v966_v31 = vpack.c.bf16 %v647_v29, %v646_v28 }
 0x333   :  { %v322_v32 = vmax.f32 %v319_v30, 0.0  ;;  %v964_v30 = vpack.c.bf16 %v629_v27, %v628_v26 }
 0x335   :  { %937 = vmatmul.mubr.f32.vlgmr.msra.gmra.mrb[6].mxu0 %v322_v32  ;;  %v630_v32 = vld [vmem:[#allocation5 + $0xa0] sm:$0xff] }
 0x336   :  { %941 = vmatprep.mubr.msk.f32.mxu0 %vm1080_vm0, %v1079_v0  ;;  %940 = vmatpush3.msk.msra.mxu0 %vm55_vm1, %v429_v33  ;;  %v631_v33 = vld [vmem:[#allocation5 + $0xa8] sm:$0xff] }
 0x337   :  { %944 = vmatprep.subr.mxu0 %v1079_v0 }
 0x408   :  { %v389_v35 = vpop.f32.mrb[6].mxu0 }
 0x409   :  { %v406_v36 = vadd.f32 %v404_v34, %v389_v35  ;;  %v938_v37 = vpop.f32.mrb[7].mxu0  ;;  %v397_v45 = vadd.f32 %v859_v44, %v389_v35  ;;  %v648_v34 = vld [vmem:[#allocation5 + $0x130] sm:$0xff]  ;;  %v649_v35 = vld [vmem:[#allocation5 + $0x138] sm:$0xff]  ;;  %v634_v44 = vld [vmem:[#allocation5 + $0xc0] sm:$0xff] }
 0x40a   :  { %v970_v37 = vpack.c.bf16 %v649_v35, %v648_v34 }
 0x40b   :  { %v407_v38 = vmul.f32 0.5, %v406_v36 }
 0x40d   :  { %v408_v39 = vmul.f32 1.442695, %v407_v38  ;;  %v632_v38 = vld [vmem:[#allocation5 + $0xb0] sm:$0xff] }
 0x40f   :  { %997 = vpow2.f32 %v408_v39  ;;  %v633_v39 = vld [vmem:[#allocation5 + $0xb8] sm:$0xff] }
 0x419   :  { %v998_v41 = vpop.eup %997 }
 0x41a   :  { %v414_v42 = vmul.f32 %v998_v41, %v412_v40  ;;  %v650_v40 = vld [vmem:[#allocation5 + $0x140] sm:$0xff]  ;;  %v651_v41 = vld [vmem:[#allocation5 + $0x148] sm:$0xff] }
 0x41c   :  { %416 = vrot.lane.b32.xlu1 %v414_v42, %s1082_s6  ;;  %v972_v42 = vpack.c.bf16 %v633_v39, %v632_v38 }
 0x420   :  { %604 = vrot.lane.b32.xlu1 %v434_v43, %s1081_s1  ;;  %v974_v43 = vpack.c.bf16 %v651_v41, %v650_v40 }
 0x424   :  { %228 = vrot.lane.b32.xlu1 %v213_v14, %s1082_s6  ;;  %v954_v14 = vpack.c.bf16 %v641_v12, %v640_v11 }
 0x426   :  { %955 = vmatprep.subr.bf16.mxu1 %v954_v14 }
 0x427   :  { %957 = vmatpush3.bf16.xpose.msra.mxu1 %v956_v18 }
 0x428   :  { %959 = vmatprep.subr.bf16.mxu1 %v958_v19  ;;  %v831_v19 = vand.u32 127, %v830_v15 }
 0x42a   :  { %vm832_vm3 = vcmp.eq.s32.totalorder %v831_v19, 4 }
 0x42f   :  { %961 = vmatpush3.bf16.xpose.msra.mxu1 %v960_v24 }
 0x430   :  { %963 = vmatprep.subr.bf16.mxu1 %v962_v25 }
 0x437   :  { %965 = vmatpush3.bf16.xpose.msra.mxu1 %v964_v30 }
 0x438   :  { %967 = vmatprep.subr.bf16.mxu1 %v966_v31 }
 0x48e   :  { %v417_v46 = vpop.permute.xlu1 %416 }
 0x48f   :  { %v419_v47 = vadd.f32 %v417_v46, %v397_v45  ;;  %v635_v45 = vld [vmem:[#allocation5 + $0xc8] sm:$0xff]  ;;  %v652_v46 = vld [vmem:[#allocation5 + $0x150] sm:$0xff] }
 0x491   :  { %942 = vmatmul.mubr.msk.f32.vlgmr.msra.gmra.mrb[8].mxu0 %vm51_vm2, %v419_v47  ;;  %v653_v47 = vld [vmem:[#allocation5 + $0x158] sm:$0xff] }
 0x492   :  { %946 = vmatprep.mubr.msk.f32.mxu0 %vm1080_vm0, %v1079_v0  ;;  %945 = vmatpush3.xpose.msra.mxu0 %v431_v48  ;;  %v605_v63 = vpop.permute.xlu1 %604  ;;  %v976_v48 = vpack.c.bf16 %v635_v45, %v634_v44  ;;  %v978_v49 = vpack.c.bf16 %v653_v47, %v652_v46 }
 0x493   :  { %949 = vmatprep.subr.mxu0 %v1079_v0 }
 0x564   :  { %v511_v51 = vpop.f32.mrb[8].mxu0 }
 0x565   :  { %v512_v52 = vadd.f32 %v861_v50, %v511_v51  ;;  %v943_v53 = vpop.f32.mrb[9].mxu0  ;;  %v636_v50 = vld [vmem:[#allocation5 + $0xd0] sm:$0xff]  ;;  %v637_v51 = vld [vmem:[#allocation5 + $0xd8] sm:$0xff] }
 0x566   :  { %v655_v53 = vld [vmem:[#allocation5 + $0x168] sm:$0xff] }
 0x567   :  { %v515_v54 = vmax.f32 %v512_v52, 0.0  ;;  %v654_v52 = vld [vmem:[#allocation5 + $0x160] sm:$0xff] }
 0x569   :  { %947 = vmatmul.mubr.f32.vlgmr.msra.gmra.mrb[10].mxu0 %v515_v54  ;;  %v980_v54 = vpack.c.bf16 %v637_v51, %v636_v50 }
 0x56a   :  { %951 = vmatprep.mubr.msk.f32.mxu0 %vm1080_vm0, %v1079_v0  ;;  %950 = vmatpush3.msk.msra.mxu0 %vm55_vm1, %v622_v55  ;;  %v229_v0 = vpop.permute.xlu1 %228  ;;  %v982_v55 = vpack.c.bf16 %v655_v53, %v654_v52 }
 0x56b   :  { %v231_v2 = vsel %vm51_vm2, %v229_v0, 0.0 }
 0x63c   :  { %v582_v57 = vpop.f32.mrb[10].mxu0 }
 0x63d   :  { %v599_v58 = vadd.f32 %v597_v56, %v582_v57  ;;  %v948_v59 = vpop.f32.mrb[11].mxu0  ;;  %v590_v6 = vadd.f32 %v864_v5, %v582_v57  ;;  %v638_v56 = vld [vmem:[#allocation5 + $0xe0] sm:$0xff]  ;;  %v639_v57 = vld [vmem:[#allocation5 + $0xe8] sm:$0xff] }
 0x63e   :  { %v866_v59 = vld [vmem:[#allocation5 + $0x68] ss:$0 sm:$0xff] }
 0x63f   :  { %v600_v60 = vmul.f32 0.5, %v599_v58  ;;  %614 = vrot.lane.b32.xlu1 %v599_v58, %s1082_s6  ;;  %v984_v58 = vpack.c.bf16 %v639_v57, %v638_v56 }
 0x641   :  { %v601_v61 = vmul.f32 1.442695, %v600_v60 }
 0x643   :  { %999 = vpow2.f32 %v601_v61 }
 0x64d   :  { %v1000_v62 = vpop.eup %999 }
 0x64e   :  { %v607_v1 = vmul.f32 %v1000_v62, %v605_v63 }
 0x650   :  { %609 = vrot.lane.b32.xlu0 %v607_v1, %s1082_s6  ;;  %v870_v1 = vld [vmem:[#allocation5 + $0x171] ss:$0 sm:$0xff] }
 0x654   :  { %421 = vrot.lane.b32.xlu0 %v406_v36, %s1082_s6  ;;  %v968_v36 = vpack.c.bf16 %v631_v33, %v630_v32 }
 0x656   :  { %969 = vmatpush3.bf16.xpose.msra.mxu1 %v968_v36 }
 0x657   :  { %971 = vmatprep.subr.bf16.mxu1 %v970_v37 }
 0x65e   :  { %973 = vmatpush3.bf16.xpose.msra.mxu1 %v972_v42 }
 0x65f   :  { %975 = vmatprep.subr.bf16.mxu1 %v974_v43 }
 0x666   :  { %977 = vmatpush3.bf16.xpose.msra.mxu1 %v976_v48 }
 0x667   :  { %979 = vmatprep.subr.bf16.mxu1 %v978_v49 }
 0x66e   :  { %981 = vmatpush3.bf16.xpose.msra.mxu1 %v980_v54 }
 0x66f   :  { %983 = vmatprep.subr.bf16.mxu1 %v982_v55 }
 0x673   :  { %232 = vadd.xlane.f32.xlu0 %v231_v2 }
 0x676   :  { %985 = vmatpush3.bf16.xpose.msra.mxu1 %v984_v58 }
 0x6b1   :  { %v615_v3 = vpop.permute.xlu1 %614 }
 0x6b2   :  { %v617_v4 = vsel %vm51_vm2, %v615_v3, 0.0 }
 0x6b3   :  { %618 = vadd.xlane.f32.xlu0 %v617_v4 }
 0x6c2   :  { %v610_v7 = vpop.permute.xlu0 %609 }
 0x6c3   :  { %v612_v8 = vadd.f32 %v610_v7, %v590_v6  ;;  %v869_v6 = vld [vmem:[#allocation5 + $0x170] ss:$0 sm:$0xff]  ;;  %v658_v7 = vld [vmem:[#allocation2 + $0x20] sm:$0xff] }
 0x6c5   :  { %952 = vmatmul.mubr.msk.f32.vlgmr.msra.gmra.mrb[12].mxu0 %vm51_vm2, %v612_v8 }
 0x6c6   :  { %v422_v9 = vpop.permute.xlu0 %421 }
 0x6c7   :  { %v424_v10 = vsel %vm51_vm2, %v422_v9, 0.0 }
 0x6c8   :  { %425 = vadd.xlane.f32.xlu1 %v424_v10 }
 0x700   :  { %v233_v13 = vpop.xlane.xlu0 %232 }
 0x701   :  { %v234_v16 = vmul.f32 -0.5, %v233_v13 }
 0x740   :  { %v619_v17 = vpop.xlane.xlu0 %618 }
 0x741   :  { %v620_v20 = vmul.f32 -0.5, %v619_v17 }
 0x755   :  { %v426_v12 = vpop.xlane.xlu1 %425 }
 0x756   :  { %v427_v14 = vmul.f32 -0.5, %v426_v12 }
 0x758   :  { %v428_v18 = vadd.f32 %v427_v14, %v234_v16 }
 0x75a   :  { %v621_v22 = vadd.f32 %v620_v20, %v428_v18 }
 0x798   :  { %v735_v60 = vpop.f32.mrb[12].mxu0 }
 0x799   :  { %v736_v61 = vadd.f32 %v866_v59, %v735_v60  ;;  %v953_v62 = vpop.f32.mrb[13].mxu0 }
 0x79b   :  { %v739_v63 = vmax.f32 %v736_v61, 0.0 }
 0x79d   :  { %917 = vmatprep.mubr.f32.mxu1 %v739_v63 }
 0x79e   :  { %918 = vmatmul.mubr.f32.vlgmr.msra.gmra.mrb[0].mxu1 %v739_v63 }
 0x871   :  { %v806_v0 = vpop.f32.mrb[0].mxu1 }
 0x872   :  { %v808_v2 = vpop.f32.mrb[1].mxu1  ;;  %v815_v9 = vadd.f32 %v869_v6, %v806_v0 }
 0x873   :  { %v820_v3 = vadd.f32 %v870_v1, %v808_v2 }
 0x875   :  { %v821_v4 = vmul.f32 0.5, %v820_v3  ;;  %826 = vadd.xlane.f32.xlu0 %v820_v3 }
 0x877   :  { %v822_v5 = vmul.f32 1.442695, %v821_v4 }
 0x879   :  { %1001 = vpow2.f32 %v822_v5 }
 0x883   :  { %v1002_v8 = vpop.eup %1001 }
 0x884   :  { %v824_v10 = vmul.f32 %v1002_v8, %v658_v7 }
 0x886   :  { %v825_v11 = vadd.f32 %v824_v10, %v815_v9 }
 0x902   :  { %v827_v21 = vpop.xlane.xlu0 %826 }
 0x903   :  { %v828_v23 = vmul.f32 -0.5, %v827_v21 }
 0x905   :  { %v829_v24 = vadd.f32 %v828_v23, %v621_v22 }
 0x907   :  { %v833_v25 = vsel %vm832_vm3, %v829_v24, %v825_v11 }
 0x908   :  { %834 = vst [vmem:[#allocation7] sm:$0xff] %v833_v25 }
 0x909   :  { %1058 = shalt.err (!%p1055_p6)
}
 0x90a   :  { %s1059_s12 = scalar_lea.hbm %s1181_s2, 128 }
 0x90b   :  { %p1060_p7 = scmp.ne.s32.totalorder %s1181_s2, %s1059_s12  ;;  %p1063_p8 = scmp.lt.u32.totalorder %s1059_s12, %s1181_s2 }
 0x90d   :  { %p1065_p9 = pnand %p1063_p8, %p1060_p7 }
 0x90f   :  { %1068 = shalt.err (!%p1065_p9)
}
 0x910   :  { %844 = dma.vmem_to_hbm [thread:$0]  %s842_s8, 128, %s1181_s2, [#allocation4]  }
 0x911   :  { %1073 = dma.done.wait [#allocation4], 128  }
 0x912   :  { %1074 = vsyncadd [#allocation4], 4294967168 }
 0x913   :  { %848 = vsyncpa [#allocation3], 1 }
 0x914   :  { %849 = vsyncpa [#allocation6], 1 }
 0x915   :  { %850 = vsyncpa [#allocation4], 1 }

</bundles_post_ra>
